<compile_context>
chip_gen: v7x
topology: tpu7x:2x2x1
jax: 0.10.0
libtpu: 0.0.40
codegen_flags: <defaults>
</compile_context>

<pallas_src>
import jax
import jax.numpy as jnp
from jax.experimental import pallas as pl
from jax.experimental.pallas import tpu as pltpu


_SMALL_IO_BYTES = 1 << 20      # below ~1 MiB of total I/O -> single-step path
_LANE_CAP = 8192               # max lane-tile elements (amortizes step cost)


def _vmem_budget_bytes():
    """Per-kernel VMEM window budget (bytes), generation aware."""
    cap = 64 * 1024 * 1024     # assume v7x (smallest per-TC VMEM) if query fails
    try:
        info = pltpu.get_tpu_info()
        cap = int(getattr(info, "vmem_capacity_bytes", cap))
    except Exception:
        pass
    # Use at most ~half of physical VMEM for the pipelined windows, leave the
    # rest for Mosaic internal scratch; never request more than 48 MiB.
    return max(8 << 20, min(cap // 2, 48 << 20))


def _pick_lane_tile(hwp, n, cin, cout, itemsize, budget_bytes, lane_cap=_LANE_CAP):
    """Largest 128-multiple that divides hwp, fits the VMEM budget, and (when
    possible) leaves >= 2 total grid steps for megacore sharding."""
    m = hwp // 128                                  # hwp is a multiple of 128
    fixed = 2 * cout * cin * itemsize + 2 * cout * 4        # W + bias (double-buffered)
    per_lane = 2 * (cin + cout) * itemsize                   # double-buffered x & y
    max_lanes = max(128, (budget_bytes - fixed) // per_lane)
    k_cap = max(1, min(lane_cap, max_lanes) // 128)

    def best_divisor(limit):
        best, d = 1, 1
        while d * d <= m:
            if m % d == 0:
                if d <= limit:
                    best = max(best, d)
                q = m // d
                if q <= limit:
                    best = max(best, q)
            d += 1
        return best

    k = best_divisor(k_cap)
    # Guarantee >= 2 grid steps so both v7x TensorCores get work (N=1 case).
    if n * (m // k) < 2 and m >= 2:
        k = best_divisor(min(k_cap, m // 2))
    return 128 * k


def _merge_tile_kernel(w_ref, b_ref, x_ref, o_ref):
    # w_ref: (Cout, Cin)  b_ref: (Cout, 1)  x_ref: (Cin, t_hw)  o_ref: (Cout, t_hw)
    acc = jnp.dot(w_ref[...], x_ref[...], preferred_element_type=jnp.float32)
    o_ref[...] = (acc + b_ref[...]).astype(o_ref.dtype)


def _merge_small_kernel(w_ref, b_ref, x_ref, o_ref):
    # Single grid step, full arrays resident.  x_ref: (N, Cin, HWp).
    w = w_ref[...]
    b = b_ref[...]
    for n in range(x_ref.shape[0]):        # tiny static batch -> unrolled
        acc = jnp.dot(w, x_ref[n], preferred_element_type=jnp.float32)
        o_ref[n] = (acc + b).astype(o_ref.dtype)


def merge_forward(x_nchw, weight, bias):
    """1x1 conv (PoseNet `Merge`, relu=False, bn=False) via Pallas.

    x_nchw : [N, Cin, H, W]
    weight : [Cout, Cin]   (nn.Conv2d 1x1 weight squeezed from [Cout, Cin, 1, 1])
    bias   : [Cout]
    returns: [N, Cout, H, W]
    """
    N, Cin, H, W = x_nchw.shape
    Cout = weight.shape[0]
    HW = H * W
    itemsize = jnp.dtype(x_nchw.dtype).itemsize

    # Mixed precision: weights are cast to the activation dtype (bf16 stays
    # bf16), accumulation is always f32.  Bias is kept in f32.
    w = weight.astype(x_nchw.dtype)                   # (Cout, Cin)
    b = bias.reshape(Cout, 1).astype(jnp.float32)     # (Cout, 1)

    # Free reshape (stays NCHW); pad H*W up to a multiple of 128 so every
    # block is lane-dense (unmasked vector stores, bounded block sizes).
    HWp = ((HW + 127) // 128) * 128
    x3 = x_nchw.reshape(N, Cin, HW)
    if HWp != HW:
        x3 = jnp.pad(x3, ((0, 0), (0, 0), (0, HWp - HW)))

    total_io_bytes = (N * (Cin + Cout) * HWp + Cout * Cin) * itemsize + Cout * 4
    cost = pl.CostEstimate(flops=2 * N * HW * Cin * Cout,
                           transcendentals=0,
                           bytes_accessed=int(total_io_bytes))

    if total_io_bytes <= _SMALL_IO_BYTES:
        # ---- small-shape fast path: one grid step, full-array blocks ------
        vmem_limit = int(max(4 * total_io_bytes + (4 << 20), 16 << 20))
        y3 = pl.pallas_call(
            _merge_small_kernel,
            out_shape=jax.ShapeDtypeStruct((N, Cout, HWp), x_nchw.dtype),
            grid_spec=pltpu.PrefetchScalarGridSpec(
                num_scalar_prefetch=0,
                grid=(1,),
                in_specs=[
                    pl.BlockSpec((Cout, Cin), lambda i: (0, 0)),
                    pl.BlockSpec((Cout, 1), lambda i: (0, 0)),
                    pl.BlockSpec((N, Cin, HWp), lambda i: (0, 0, 0)),
                ],
                out_specs=pl.BlockSpec((N, Cout, HWp), lambda i: (0, 0, 0)),
            ),
            compiler_params=pltpu.CompilerParams(
                dimension_semantics=("arbitrary",),
                vmem_limit_bytes=vmem_limit),
            cost_estimate=cost,
        )(w, b, x3)
    else:
        # ---- tiled path: per-image (Cout,Cin) x (Cin,t_hw) MXU matmul -----
        budget = _vmem_budget_bytes()
        t_hw = _pick_lane_tile(HWp, N, Cin, Cout, itemsize, budget)
        grid = (N, HWp // t_hw)
        footprint = (2 * (Cin + Cout) * t_hw * itemsize   # double-buffered x & y
                     + 2 * Cout * Cin * itemsize          # weight (2 resident copies)
                     + 2 * Cout * 4)                      # bias
        vmem_limit = int(max(footprint + (4 << 20), 16 << 20))

        y3 = pl.pallas_call(
            _merge_tile_kernel,
            out_shape=jax.ShapeDtypeStruct((N, Cout, HWp), x_nchw.dtype),
            grid_spec=pltpu.PrefetchScalarGridSpec(
                num_scalar_prefetch=0,
                grid=grid,
                in_specs=[
                    pl.BlockSpec((Cout, Cin), lambda n, j: (0, 0)),      # resident W
                    pl.BlockSpec((Cout, 1), lambda n, j: (0, 0)),        # resident bias
                    pl.BlockSpec((None, Cin, t_hw), lambda n, j: (n, 0, j)),
                ],
                out_specs=pl.BlockSpec((None, Cout, t_hw), lambda n, j: (n, 0, j)),
            ),
            compiler_params=pltpu.CompilerParams(
                dimension_semantics=("parallel", "parallel"),
                vmem_limit_bytes=vmem_limit),
            cost_estimate=cost,
        )(w, b, x3)

    if HWp != HW:
        y3 = y3[:, :, :HW]
    return y3.reshape(N, Cout, H, W)


def _reference(x_nchw, weight, bias):
    # Plain-JAX reference for the 1x1 conv.
    return jnp.einsum("nchw,oc->nohw", x_nchw, weight) + bias[None, :, None, None]


def _make_case(key, n, cin, cout, h, w, dtype=jnp.float32):
    k_x, k_w, k_b = jax.random.split(key, 3)
    x = jax.random.normal(k_x, (n, cin, h, w), dtype=dtype)
    # PyTorch default conv init scale (fan_in = cin for a 1x1 kernel).
    bound = 1.0 / (cin ** 0.5)
    weight = jax.random.uniform(k_w, (cout, cin), minval=-bound, maxval=bound,
                                dtype=jnp.float32)
    bias = jax.random.uniform(k_b, (cout,), minval=-bound, maxval=bound,
                              dtype=jnp.float32)
    return x, weight, bias


if __name__ == "__main__":
    root = jax.random.PRNGKey(0)
    keys = jax.random.split(root, 3)

    # (key, N, Cin, Cout, H, W, atol/rtol)
    #  1) Required small shape (Merge(4, 8) on 2x4x16x16)  -> single-step fast path.
    #  2) Larger even-HW shape -> tiled path, >=2-step megacore split.
    #  3) Odd spatial size     -> wrapper-side lane padding on the tiled path.
    cases = [
        (keys[0], 2, 4, 8, 16, 16, 1e-5),
        (keys[1], 1, 32, 16, 96, 96, 5e-3),
        (keys[2], 1, 64, 16, 71, 71, 5e-3),
    ]

    for key, n, cin, cout, h, w, tol in cases:
        x, weight, bias = _make_case(key, n, cin, cout, h, w)
        out = jax.block_until_ready(merge_forward(x, weight, bias))
        ref = _reference(x, weight, bias)
        assert out.shape == (n, cout, h, w), (out.shape, (n, cout, h, w))
        assert jnp.allclose(out, ref, atol=tol, rtol=tol), (n, cin, cout, h, w)

    print("KERNEL_OK")
</pallas_src>

<mosaic_0001>
module attributes {stable_mosaic.version = 11 : i64} {
  func.func @_merge_small_kernel(%arg0: i32, %arg1: memref<8x4xf32, #tpu.memory_space<vmem>>, %arg2: memref<8x1xf32, #tpu.memory_space<vmem>>, %arg3: memref<2x4x256xf32, #tpu.memory_space<vmem>>, %arg4: memref<2x8x256xf32, #tpu.memory_space<vmem>>) attributes {dimension_semantics = [#tpu.dimension_semantics<arbitrary>], iteration_bounds = array<i64: 1>, scalar_prefetch = 0 : i64, scratch_operands = 0 : i64, tpu.core_type = #tpu.core_type<tc>, window_params = [{pipeline_mode = #tpu.pipeline_mode<synchronous>, transform_indices = @transform_0, window_bounds = array<i64: 8, 4>}, {pipeline_mode = #tpu.pipeline_mode<synchronous>, transform_indices = @transform_1, window_bounds = array<i64: 8, 1>}, {pipeline_mode = #tpu.pipeline_mode<synchronous>, transform_indices = @transform_2, window_bounds = array<i64: 2, 4, 256>}, {pipeline_mode = #tpu.pipeline_mode<synchronous>, transform_indices = @transform_3, window_bounds = array<i64: 2, 8, 256>}]} {
    %c0 = arith.constant 0 : index
    %c0_0 = arith.constant 0 : index
    %0 = vector.load %arg1[%c0, %c0_0] : memref<8x4xf32, #tpu.memory_space<vmem>>, vector<8x4xf32>
    %c0_1 = arith.constant 0 : index
    %c0_2 = arith.constant 0 : index
    %1 = vector.load %arg2[%c0_1, %c0_2] : memref<8x1xf32, #tpu.memory_space<vmem>>, vector<8x1xf32>
    %c0_3 = arith.constant 0 : index
    %c0_4 = arith.constant 0 : index
    %c0_5 = arith.constant 0 : index
    %2 = vector.load %arg3[%c0_3, %c0_4, %c0_5] : memref<2x4x256xf32, #tpu.memory_space<vmem>>, vector<1x4x256xf32>
    %3 = vector.shape_cast %2 : vector<1x4x256xf32> to vector<4x256xf32>
    %cst = arith.constant dense<0.000000e+00> : vector<8x256xf32>
    %4 = tpu.matmul %0, %3, %cst {dimension_numbers = #tpu.dot_dimension_numbers<[1], [0], [0], [1], [0, 0, 1, 1], [], []>} : vector<8x4xf32>, vector<4x256xf32>, vector<8x256xf32> -> vector<8x256xf32>
    %5 = vector.broadcast %1 : vector<8x1xf32> to vector<8x256xf32>
    %6 = arith.addf %4, %5 : vector<8x256xf32>
    %c0_6 = arith.constant 0 : index
    %c0_7 = arith.constant 0 : index
    %c0_8 = arith.constant 0 : index
    %7 = vector.load %arg4[%c0_6, %c0_7, %c0_8] : memref<2x8x256xf32, #tpu.memory_space<vmem>>, vector<1x8x256xf32>
    %8 = vector.shape_cast %7 : vector<1x8x256xf32> to vector<8x256xf32>
    %9 = vector.shape_cast %6 : vector<8x256xf32> to vector<1x8x256xf32>
    tpu.vector_store %arg4[%c0_6, %c0_7, %c0_8], %9 {strides = array<i32>} : memref<2x8x256xf32, #tpu.memory_space<vmem>>, vector<1x8x256xf32>,
    %c1 = arith.constant 1 : index
    %c0_9 = arith.constant 0 : index
    %c0_10 = arith.constant 0 : index
    %10 = vector.load %arg3[%c1, %c0_9, %c0_10] : memref<2x4x256xf32, #tpu.memory_space<vmem>>, vector<1x4x256xf32>
    %11 = vector.shape_cast %10 : vector<1x4x256xf32> to vector<4x256xf32>
    %cst_11 = arith.constant dense<0.000000e+00> : vector<8x256xf32>
    %12 = tpu.matmul %0, %11, %cst_11 {dimension_numbers = #tpu.dot_dimension_numbers<[1], [0], [0], [1], [0, 0, 1, 1], [], []>} : vector<8x4xf32>, vector<4x256xf32>, vector<8x256xf32> -> vector<8x256xf32>
    %13 = vector.broadcast %1 : vector<8x1xf32> to vector<8x256xf32>
    %14 = arith.addf %12, %13 : vector<8x256xf32>
    %c1_12 = arith.constant 1 : index
    %c0_13 = arith.constant 0 : index
    %c0_14 = arith.constant 0 : index
    %15 = vector.load %arg4[%c1_12, %c0_13, %c0_14] : memref<2x8x256xf32, #tpu.memory_space<vmem>>, vector<1x8x256xf32>
    %16 = vector.shape_cast %15 : vector<1x8x256xf32> to vector<8x256xf32>
    %17 = vector.shape_cast %14 : vector<8x256xf32> to vector<1x8x256xf32>
    tpu.vector_store %arg4[%c1_12, %c0_13, %c0_14], %17 {strides = array<i32>} : memref<2x8x256xf32, #tpu.memory_space<vmem>>, vector<1x8x256xf32>,
    return
  }
  func.func @transform_0(%arg0: i32) -> (i32, i32) {
    %c0_i32 = arith.constant 0 : i32
    %c0_i32_0 = arith.constant 0 : i32
    %c0_i32_1 = arith.constant 0 : i32
    return %c0_i32, %c0_i32_0 : i32, i32
  }
  func.func @transform_1(%arg0: i32) -> (i32, i32) {
    %c0_i32 = arith.constant 0 : i32
    %c0_i32_0 = arith.constant 0 : i32
    %c0_i32_1 = arith.constant 0 : i32
    return %c0_i32, %c0_i32_0 : i32, i32
  }
  func.func @transform_2(%arg0: i32) -> (i32, i32, i32) {
    %c0_i32 = arith.constant 0 : i32
    %c0_i32_0 = arith.constant 0 : i32
    %c0_i32_1 = arith.constant 0 : i32
    %c0_i32_2 = arith.constant 0 : i32
    return %c0_i32, %c0_i32_0, %c0_i32_1 : i32, i32, i32
  }
  func.func @transform_3(%arg0: i32) -> (i32, i32, i32) {
    %c0_i32 = arith.constant 0 : i32
    %c0_i32_0 = arith.constant 0 : i32
    %c0_i32_1 = arith.constant 0 : i32
    %c0_i32_2 = arith.constant 0 : i32
    return %c0_i32, %c0_i32_0, %c0_i32_1 : i32, i32, i32
  }
}

</mosaic_0001>

<bundles_post_ra>
// kernel: tpu_custom_call.1
= control target key start
LH: loop header
LB: loop body
LE: loop exit
PB: predicated region body
PF: predicated region fallthrough
CT: control target
= control target key end

     0   :  { %vm29_vm0 = vcmask 1043456   ;;  %v244_v4 = vmov 0.0   ;;  %s297_s0 = inlined_call_operand.vmem [shape: f32[8,4], index: 0, kind: input, shape index: {}]   ;;  %s298_s1 = inlined_call_operand.vmem [shape: f32[8,1], index: 1, kind: input, shape index: {}]   ;;  %s299_s2 = inlined_call_operand.vmem [shape: f32[2,4,256], index: 2, kind: input, shape index: {}]   ;;  %s300_s3 = inlined_call_operand.hbm [shape: f32[2,8,256], index: 3, kind: output, shape index: {}]  }
   0x1   :  { %v17_v0 = vld [vmem:[%s299_s2] sm:$0xff]  ;;  %v208_v1 = vld [vmem:[%s299_s2 + $0x8] sm:$0xff]  ;;  %98 = vmatprep.mubr.f32.mxu0 %v244_v4  ;;  %179 = vmatprep.mubr.f32.mxu1 %v244_v4 }
   0x2   :  { %v24_v2 = vcombine.high %v17_v0, %v17_v0  ;;  %v110_v3 = vcombine.high %v208_v1, %v208_v1 }
   0x3   :  { %8 = vsyncpa [#allocation3], 0  ;;  %v15_v5 = vld [vmem:[%s297_s0] sm:$0xff]  ;;  %vm25_vm1 = vcmask 31744   ;;  %v245_v6 = vmov 0   ;;  %s246_s0 = smov [#allocation2]  }
   0x4   :  { %217 = vset.pattern.permute.xlu0 %v245_v6  ;;  %205 = vmatprep.subr.msk.mxu0 %vm29_vm0, %v24_v2  ;;  %v16_v7 = vld [vmem:[%s298_s1] sm:$0xff]  ;;  %s194_s2 = sshll.u32 %s246_s0, 4  ;;  %s195_s2 = int_to_ptr.vmem [resolvable:$true] %s194_s2 }
   0x5   :  { %209 = vmatprep.subr.msk.mxu1 %vm29_vm0, %v110_v3  ;;  %206 = vmatpush1.msk.msra.mxu0 %vm29_vm0, %v17_v0  ;;  %s220_s1 = scalar_lea.vmem %s195_s2, 512  ;;  %p225_p1 = scmp.lt.s32.totalorder %s195_s2, %s195_s2 }
   0x6   :  { %210 = vmatpush1.msk.msra.mxu1 %vm29_vm0, %v208_v1  ;;  %207 = vmatmul.mubr.msk.f32.vlgmr.msra.gmra.mrb[0].mxu0 %vm25_vm1, %v15_v5  ;;  %p221_p0 = scmp.ne.s32.totalorder %s195_s2, %s220_s1  ;;  %p226_p2 = scmp.lt.s32.totalorder %s220_s1, %s220_s1 }
   0x7   :  { %211 = vmatmul.mubr.msk.f32.vlgmr.msra.gmra.mrb[0].mxu1 %vm25_vm1, %v15_v5  ;;  %20 = vperm.xlu0 %217, %v16_v7  }
   0x8   :  { %p227_p3 = por %p226_p2, %p225_p1 }
   0xa   :  { %p228_p4 = pnand %p227_p3, %p221_p0 }
  0x86   :  { %v21_v8 = vpop.permute.xlu0 %20 }
  0xd9   :  { %v100_v9 = vpop.f32.mrb[0].mxu0 }
  0xda   :  { %v181_v10 = vpop.f32.mrb[0].mxu1  ;;  %v101_v11 = vadd.f32 %v100_v9, %v21_v8  ;;  %v102_v13 = vpop.f32.mrb[1].mxu0 }
  0xdb   :  { %v182_v12 = vadd.f32 %v181_v10, %v21_v8  ;;  %v183_v14 = vpop.f32.mrb[1].mxu1  ;;  %v103_v15 = vadd.f32 %v102_v13, %v21_v8 }
  0xdc   :  { %v184_v16 = vadd.f32 %v183_v14, %v21_v8  ;;  %105 = vst [vmem:[#allocation2] sm:$0xff] %v101_v11 }
  0xdd   :  { %187 = vst [vmem:[#allocation2 + $0x10] sm:$0xff] %v182_v12  ;;  %106 = vst [vmem:[#allocation2 + $0x8] sm:$0xff] %v103_v15 }
  0xde   :  { %188 = vst [vmem:[#allocation2 + $0x18] sm:$0xff] %v184_v16 }
  0xdf   :  { %231 = shalt.err (!%p228_p4)
}
  0xe0   :  { %s232_s22 = scalar_lea.hbm %s300_s3, 512 }
  0xe1   :  { %p233_p5 = scmp.ne.s32.totalorder %s300_s3, %s232_s22  ;;  %p236_p6 = scmp.lt.u32.totalorder %s232_s22, %s300_s3 }
  0xe3   :  { %p238_p7 = pnand %p236_p6, %p233_p5 }
  0xe5   :  { %241 = shalt.err (!%p238_p7)
}
  0xe6   :  { %s247_s27 = smov 256   ;;  %s248_s28 = smov 16  }
  0xe7   :  { %200 = dma.vmem_to_hbm [thread:$0]  %s195_s2, 512, %s300_s3, [#allocation3], %s247_s27, %s247_s27, %s248_s28  }
  0xe8   :  { %242 = dma.done.wait [#allocation3], 512  }
  0xe9   :  { %243 = vsyncadd [#allocation3], 4294966784 }
  0xea   :  { %204 = vsyncpa [#allocation3], 1 }

</bundles_post_ra>
